<compile_context>
chip_gen: v7x
topology: tpu7x:2x2x1
jax: 0.10.0
libtpu: 0.0.40
codegen_flags: <defaults>
</compile_context>

<pallas_src>
import jax
import jax.numpy as jnp
from jax.experimental import pallas as pl
from jax.experimental.pallas import tpu as pltpu


# ----------------------------------------------------------------------------
# Kernel
# ----------------------------------------------------------------------------
def _quant_relu_kernel(x_ref, s_ref, o_ref, *, int_max):
    x = x_ref[...].astype(jnp.float32)     # (TR, TL) activation tile
    s = s_ref[...]                         # (1, TL) f32 per-lane (per-channel) scale
    relu = jnp.maximum(x, 0.0)
    # Brevitas divides the (post-ReLU) value by the scale before rounding.
    q_int = jnp.clip(jnp.round(relu / s), 0.0, float(int_max))
    # Module epilogue 2*act + (-1)*act == act exactly in f32 (Sterbenz) -> fold.
    o_ref[...] = (q_int * s).astype(o_ref.dtype)


# ----------------------------------------------------------------------------
# Tiling helpers
# ----------------------------------------------------------------------------
def _round_up(n, m):
    return -(-n // m) * m


def _largest_divisor_tile(dim, base, cap):
    """Largest multiple of `base` dividing `dim`, <= min(dim, cap).
    Assumes dim % base == 0 (guaranteed by the padding logic)."""
    best = base
    t = base
    limit = min(dim, max(cap, base))
    while t <= limit:
        if dim % t == 0:
            best = t
        t += base
    return best


def _vmem_plan():
    """Return (tile VMEM budget bytes, explicit vmem_limit_bytes or None)."""
    try:
        kind = jax.devices()[0].device_kind.lower()
    except Exception:
        kind = ""
    if ("v5e" in kind) or ("v5" in kind and "lite" in kind):
        # v5e: 16 MiB scoped-VMEM default; low HBM BW already amortizes the
        # per-step overhead at ~2-3 MiB tiles, so stay under the default.
        return 12 << 20, None
    if "v7" in kind:
        # v7x: 64 MiB physical VMEM; raise the scoped limit with headroom.
        return 32 << 20, 48 << 20
    # v6e / other: 128 MiB physical VMEM.
    return 48 << 20, 64 << 20


# ----------------------------------------------------------------------------
# Wrapper: full module forward
# ----------------------------------------------------------------------------
def quant_relu_model(x_nchw, abits=4, scaling=None, max_val=6.0,
                     scaling_min_val=2e-16):
    """Forward pass of PyTorchTestModel.  x_nchw: (N, C, H, W).

    `scaling` (shape (C,)) is the learned per-channel scaling parameter value;
    defaults to its initialization (max_val for every channel).
    """
    N, C, H, W = x_nchw.shape
    int_max = (1 << abits) - 1
    dtype = x_nchw.dtype
    ebytes = jnp.dtype(dtype).itemsize

    # --- per-channel quantization scale (parameter math, done once) ---------
    if scaling is None:
        scaling = jnp.full((C,), max_val, dtype=jnp.float32)
    scaling = jnp.maximum(scaling.astype(jnp.float32), scaling_min_val)
    scale_c = scaling / float(int_max)                       # (C,)

    # --- lane-dense contiguous view: rows = N, lanes = C*H*W ----------------
    L = C * H * W
    x2d = x_nchw.reshape(N, L)                               # free reshape
    scale_row = jnp.repeat(scale_c, H * W).reshape(1, L)     # (1, C*H*W) f32

    # --- alignment / padding (avoid masked stores & giant fallback blocks) --
    row_align = 8 if ebytes >= 4 else (16 if ebytes == 2 else 32)
    if N % row_align == 0 or N < row_align:
        Rp = N                          # multiple of align, or legal full-dim block
    else:
        Rp = _round_up(N, row_align)
    Lp = L if L % 128 == 0 else _round_up(L, 128)

    if Rp != N or Lp != L:
        x2d = jnp.pad(x2d, ((0, Rp - N), (0, Lp - L)))
    if Lp != L:
        scale_row = jnp.pad(scale_row, ((0, 0), (0, Lp - L)), constant_values=1.0)

    # --- generation-aware tile sizes ----------------------------------------
    budget, vmem_limit = _vmem_plan()
    if Rp % row_align == 0:
        TR = _largest_divisor_tile(Rp, row_align, 256)
    else:
        TR = Rp                         # small row count: full-dim block
    # double-buffered in + out tiles plus the (1, TL) f32 scale row:
    bytes_per_lane = 4 * TR * ebytes + 2 * 4
    TL_cap = max(128, min(8192, (budget // bytes_per_lane) // 128 * 128))
    TL = _largest_divisor_tile(Lp, 128, TL_cap)

    grid = (Rp // TR, Lp // TL)

    cp_kwargs = dict(dimension_semantics=("parallel", "parallel"))
    if vmem_limit is not None:
        cp_kwargs["vmem_limit_bytes"] = vmem_limit

    kernel = lambda x_ref, s_ref, o_ref: _quant_relu_kernel(
        x_ref, s_ref, o_ref, int_max=int_max)

    out2d = pl.pallas_call(
        kernel,
        out_shape=jax.ShapeDtypeStruct((Rp, Lp), dtype),
        grid=grid,
        in_specs=[
            pl.BlockSpec((TR, TL), lambda i, j: (i, j)),   # activations
            pl.BlockSpec((1, TL), lambda i, j: (0, j)),    # per-lane scale row
        ],
        out_specs=pl.BlockSpec((TR, TL), lambda i, j: (i, j)),
        compiler_params=pltpu.CompilerParams(**cp_kwargs),
    )(x2d, scale_row)

    return out2d[:N, :L].reshape(N, C, H, W)


# ----------------------------------------------------------------------------
# Pure-JAX reference of the full module forward (keeps the 2a - a epilogue)
# ----------------------------------------------------------------------------
def _reference(x_nchw, abits=4, scaling=None, max_val=6.0,
               scaling_min_val=2e-16):
    N, C, H, W = x_nchw.shape
    int_max = (1 << abits) - 1
    if scaling is None:
        scaling = jnp.full((C,), max_val, dtype=jnp.float32)
    scaling = jnp.maximum(scaling.astype(jnp.float32), scaling_min_val)
    scale = (scaling / float(int_max)).reshape(1, C, 1, 1)
    relu = jnp.maximum(x_nchw.astype(jnp.float32), 0.0)
    act = jnp.clip(jnp.round(relu / scale), 0.0, float(int_max)) * scale
    y0 = act * 2.0
    y1 = act * -1.0
    return (y0 + y1).astype(x_nchw.dtype)


if __name__ == "__main__":
    key = jax.random.PRNGKey(0)
    # C=32 matches out_channels of the per-channel QuantReLU in the module.
    N, C, H, W = 2, 32, 8, 8
    abits = 4
    # Inputs spanning below 0 (ReLU region) and above max_val=6.0 (clip region).
    x = jax.random.uniform(key, (N, C, H, W), jnp.float32, minval=-4.0, maxval=8.0)

    y = quant_relu_model(x, abits=abits)
    y = jax.block_until_ready(y)

    y_ref = _reference(x, abits=abits)
    assert y.shape == (N, C, H, W)
    assert jnp.allclose(y, y_ref, atol=1e-6), "mismatch vs reference"

    print("KERNEL_OK")
</pallas_src>

<mosaic_0001>
module attributes {stable_mosaic.version = 11 : i64} {
  func.func @_lambda_(%arg0: i32, %arg1: i32, %arg2: memref<2x2048xf32, #tpu.memory_space<vmem>>, %arg3: memref<1x2048xf32, #tpu.memory_space<vmem>>, %arg4: memref<2x2048xf32, #tpu.memory_space<vmem>>) attributes {dimension_semantics = [#tpu.dimension_semantics<parallel>, #tpu.dimension_semantics<parallel>], iteration_bounds = array<i64: 1, 1>, scalar_prefetch = 0 : i64, scratch_operands = 0 : i64, tpu.core_type = #tpu.core_type<tc>, window_params = [{transform_indices = @transform_0, window_bounds = array<i64: 2, 2048>}, {transform_indices = @transform_1, window_bounds = array<i64: 1, 2048>}, {transform_indices = @transform_2, window_bounds = array<i64: 2, 2048>}]} {
    %c0 = arith.constant 0 : index
    %c0_0 = arith.constant 0 : index
    %0 = vector.load %arg2[%c0, %c0_0] : memref<2x2048xf32, #tpu.memory_space<vmem>>, vector<2x2048xf32>
    %c0_1 = arith.constant 0 : index
    %c0_2 = arith.constant 0 : index
    %1 = vector.load %arg3[%c0_1, %c0_2] : memref<1x2048xf32, #tpu.memory_space<vmem>>, vector<1x2048xf32>
    %cst = arith.constant 0.000000e+00 : f32
    %2 = vector.broadcast %cst : f32 to vector<2x2048xf32>
    %3 = arith.maximumf %0, %2 : vector<2x2048xf32>
    %4 = vector.broadcast %1 : vector<1x2048xf32> to vector<2x2048xf32>
    %5 = arith.divf %3, %4 : vector<2x2048xf32>
    %6 = math.roundeven %5 : vector<2x2048xf32>
    %cst_3 = arith.constant 0.000000e+00 : f32
    %cst_4 = arith.constant 1.500000e+01 : f32
    %7 = vector.broadcast %cst_3 : f32 to vector<2x2048xf32>
    %8 = arith.maximumf %7, %6 : vector<2x2048xf32>
    %9 = vector.broadcast %cst_4 : f32 to vector<2x2048xf32>
    %10 = arith.minimumf %9, %8 : vector<2x2048xf32>
    %11 = vector.broadcast %1 : vector<1x2048xf32> to vector<2x2048xf32>
    %12 = arith.mulf %10, %11 : vector<2x2048xf32>
    %c0_5 = arith.constant 0 : index
    %c0_6 = arith.constant 0 : index
    %13 = vector.load %arg4[%c0_5, %c0_6] : memref<2x2048xf32, #tpu.memory_space<vmem>>, vector<2x2048xf32>
    tpu.vector_store %arg4[%c0_5, %c0_6], %12 {strides = array<i32>} : memref<2x2048xf32, #tpu.memory_space<vmem>>, vector<2x2048xf32>,
    return
  }
  func.func @transform_0(%arg0: i32, %arg1: i32) -> (i32, i32) {
    %c0_i32 = arith.constant 0 : i32
    return %arg0, %arg1 : i32, i32
  }
  func.func @transform_1(%arg0: i32, %arg1: i32) -> (i32, i32) {
    %c0_i32 = arith.constant 0 : i32
    %c0_i32_0 = arith.constant 0 : i32
    return %c0_i32, %arg1 : i32, i32
  }
  func.func @transform_2(%arg0: i32, %arg1: i32) -> (i32, i32) {
    %c0_i32 = arith.constant 0 : i32
    return %arg0, %arg1 : i32, i32
  }
}

</mosaic_0001>

<bundles_post_ra>
// kernel: tpu_custom_call.1
= control target key start
LH: loop header
LB: loop body
LE: loop exit
PB: predicated region body
PF: predicated region fallthrough
CT: control target
= control target key end

     0   :  { %7 = vsyncpa [#allocation3], 0  ;;  %s371_s0 = inlined_call_operand.hbm [shape: f32[2,2048], index: 0, kind: input, shape index: {}]   ;;  %s372_s1 = inlined_call_operand.hbm [shape: f32[1,2048], index: 1, kind: input, shape index: {}]   ;;  %s373_s2 = inlined_call_operand.hbm [shape: f32[2,2048], index: 2, kind: output, shape index: {}]  }
   0x1   :  { %8 = vsyncpa [#allocation6], 0 }
   0x2   :  { %9 = vsyncpa [#allocation4], 0  ;;  %s316_s9 = smov [#allocation2]   ;;  %s317_s11 = smov [#allocation5]  }
   0x3   :  { %s16_s10 = sshll.u32 %s316_s9, 4  ;;  %s26_s12 = sshll.u32 %s317_s11, 4  ;;  %s17_s10 = int_to_ptr.vmem [resolvable:$true] %s16_s10  ;;  %s27_s12 = int_to_ptr.vmem [resolvable:$true] %s26_s12 }
   0x4   :  { %s244_s15 = scalar_lea.hbm %s371_s0, 512 }
   0x5   :  { %p245_p0 = scmp.ne.s32.totalorder %s371_s0, %s244_s15  ;;  %p248_p1 = scmp.lt.u32.totalorder %s244_s15, %s371_s0 }
   0x7   :  { %p250_p2 = pnand %p248_p1, %p245_p0 }
   0x9   :  { %253 = shalt.err (!%p250_p2)
}
   0xa   :  { %s254_s20 = scalar_lea.vmem %s17_s10, 512  ;;  %p259_p4 = scmp.lt.s32.totalorder %s17_s10, %s17_s10 }
   0xb   :  { %p255_p3 = scmp.ne.s32.totalorder %s17_s10, %s254_s20  ;;  %p260_p5 = scmp.lt.s32.totalorder %s254_s20, %s254_s20 }
   0xd   :  { %p261_p6 = por %p260_p5, %p259_p4 }
   0xf   :  { %p262_p7 = pnand %p261_p6, %p255_p3 }
  0x11   :  { %265 = shalt.err (!%p262_p7)
}
  0x12   :  { %19 = dma.hbm_to_vmem [thread:$0]  %s371_s0, 512, %s17_s10, [#allocation3]  }
  0x13   :  { %s266_s25 = scalar_lea.hbm %s372_s1, 256 }
  0x14   :  { %p267_p8 = scmp.ne.s32.totalorder %s372_s1, %s266_s25  ;;  %p270_p9 = scmp.lt.u32.totalorder %s266_s25, %s372_s1 }
  0x16   :  { %p272_p10 = pnand %p270_p9, %p267_p8 }
  0x18   :  { %275 = shalt.err (!%p272_p10)
}
  0x19   :  { %s276_s30 = scalar_lea.vmem %s27_s12, 256  ;;  %p281_p12 = scmp.lt.s32.totalorder %s27_s12, %s27_s12 }
  0x1a   :  { %p277_p11 = scmp.ne.s32.totalorder %s27_s12, %s276_s30  ;;  %p282_p13 = scmp.lt.s32.totalorder %s276_s30, %s276_s30 }
  0x1c   :  { %p283_p0 = por %p282_p13, %p281_p12 }
  0x1e   :  { %p284_p1 = pnand %p283_p0, %p277_p11 }
  0x20   :  { %287 = shalt.err (!%p284_p1)
}
  0x21   :  { %29 = dma.hbm_to_vmem [thread:$0]  %s372_s1, 256, %s27_s12, [#allocation6]  }
  0x22   :  { %310 = dma.done.wait [#allocation3], 512  }
  0x23   :  { %311 = vsyncadd [#allocation3], 4294966784 }
  0x24   :  { %312 = dma.done.wait [#allocation6], 256  }
  0x25   :  { %313 = vsyncadd [#allocation6], 4294967040  ;;  %v48_v0 = vlaneseq  ;;  %v318_v1 = vmov 1983009808   ;;  %v40_v13 = vld [vmem:[#allocation5] sm:$0xff]  ;;  %v41_v18 = vld [vmem:[#allocation5 + $0x8] sm:$0xff] }
  0x26   :  { %v115_v2 = vunpack.c.l.s4 %v318_v1  ;;  %v36_v51 = vld [vmem:[#allocation2] sm:$0xff]  ;;  %v37_v53 = vld [vmem:[#allocation2 + $0x8] sm:$0xff]  ;;  %v38_v55 = vld [vmem:[#allocation2 + $0x10] sm:$0xff]  ;;  %s319_s1 = smov [#allocation7]  }
  0x27   :  { %v49_v3 = vshrl.u32 %v48_v0, 7  ;;  %v42_v54 = vmax.f32 %v36_v51, 0.0  ;;  %v43_v56 = vmax.f32 %v37_v53, 0.0  ;;  %v44_v58 = vmax.f32 %v38_v55, 0.0  ;;  %v39_v59 = vld [vmem:[#allocation2 + $0x18] sm:$0xff]  ;;  %s218_s4 = sshll.u32 %s319_s1, 4  ;;  %s219_s4 = int_to_ptr.vmem [resolvable:$true] %s218_s4 }
  0x28   :  { %v116_v7 = vunpack.c.0.s8 %v115_v2  ;;  %v45_v1 = vmax.f32 %v39_v59, 0.0  ;;  %s288_s5 = scalar_lea.vmem %s219_s4, 512  ;;  %p293_p3 = scmp.lt.s32.totalorder %s219_s4, %s219_s4 }
  0x29   :  { %v50_v4 = vsub.s32 0, %v49_v3  ;;  %v54_v5 = vsub.s32 1, %v49_v3  ;;  %v58_v6 = vsub.s32 2, %v49_v3  ;;  %v62_v8 = vsub.s32 3, %v49_v3  ;;  %p289_p2 = scmp.ne.s32.totalorder %s219_s4, %s288_s5  ;;  %p294_p4 = scmp.lt.s32.totalorder %s288_s5, %s288_s5 }
  0x2a   :  { %v66_v9 = vsub.s32 4, %v49_v3  ;;  %v70_v10 = vsub.s32 5, %v49_v3  ;;  %v74_v11 = vsub.s32 6, %v49_v3  ;;  %v78_v12 = vsub.s32 7, %v49_v3 }
  0x2b   :  { %v51_v14 = vrot.slane %v40_v13, %v50_v4  ;;  %v55_v15 = vrot.slane %v40_v13, %v54_v5  ;;  %v59_v16 = vrot.slane %v40_v13, %v58_v6  ;;  %v119_v17 = vsub.s32 %v116_v7, %v49_v3  ;;  %p295_p5 = por %p294_p4, %p293_p3 }
  0x2c   :  { %v63_v19 = vrot.slane %v40_v13, %v62_v8  ;;  %v67_v20 = vrot.slane %v40_v13, %v66_v9  ;;  %v71_v21 = vrot.slane %v40_v13, %v70_v10  ;;  %v75_v23 = vrot.slane %v40_v13, %v74_v11 }
  0x2d   :  { %v112_v22 = vcombine.low %v51_v14, %v55_v15  ;;  %v79_v24 = vrot.slane %v40_v13, %v78_v12  ;;  %v83_v27 = vrot.slane %v41_v18, %v50_v4  ;;  %v87_v28 = vrot.slane %v41_v18, %v54_v5  ;;  %p296_p6 = pnand %p295_p5, %p289_p2 }
  0x2e   :  { %v113_v25 = vcombine.low %v59_v16, %v63_v19  ;;  %v129_v26 = vcombine.low %v67_v20, %v71_v21  ;;  %v91_v31 = vrot.slane %v41_v18, %v58_v6  ;;  %v95_v32 = vrot.slane %v41_v18, %v62_v8 }
  0x2f   :  { %v120_v29 = vrot.slane %v112_v22, %v119_v17  ;;  %v130_v30 = vcombine.low %v75_v23, %v79_v24  ;;  %v146_v35 = vcombine.low %v83_v27, %v87_v28  ;;  %v99_v38 = vrot.slane %v41_v18, %v66_v9 }
  0x30   :  { %v127_v33 = vrot.slane %v113_v25, %v119_v17  ;;  %v137_v34 = vrot.slane %v129_v26, %v119_v17  ;;  %v147_v37 = vcombine.low %v91_v31, %v95_v32  ;;  %v103_v39 = vrot.slane %v41_v18, %v70_v10 }
  0x31   :  { %v144_v36 = vrot.slane %v130_v30, %v119_v17  ;;  %v154_v41 = vrot.slane %v146_v35, %v119_v17  ;;  %v107_v42 = vrot.slane %v41_v18, %v74_v11  ;;  %v111_v43 = vrot.slane %v41_v18, %v78_v12 }
  0x32   :  { %v128_v40 = vcombine.low %v120_v29, %v127_v33  ;;  %v161_v45 = vrot.slane %v147_v37, %v119_v17  ;;  %v163_v46 = vcombine.low %v99_v38, %v103_v39 }
  0x33   :  { %v145_v44 = vcombine.low %v137_v34, %v144_v36  ;;  %v164_v47 = vcombine.low %v107_v42, %v111_v43 }
  0x34   :  { %236 = vrcp.f32 %v128_v40  ;;  %v162_v48 = vcombine.low %v154_v41, %v161_v45  ;;  %v171_v49 = vrot.slane %v163_v46, %v119_v17 }
  0x35   :  { %238 = vrcp.f32 %v145_v44  ;;  %v178_v50 = vrot.slane %v164_v47, %v119_v17 }
  0x36   :  { %240 = vrcp.f32 %v162_v48 }
  0x37   :  { %v179_v52 = vcombine.low %v171_v49, %v178_v50 }
  0x39   :  { %242 = vrcp.f32 %v179_v52 }
  0x3e   :  { %v237_v57 = vpop.eup %236 }
  0x3f   :  { %v239_v60 = vpop.eup %238  ;;  %v185_v61 = vmul.f32 %v237_v57, %v42_v54 }
  0x40   :  { %v187_v62 = vmul.f32 %v239_v60, %v43_v56  ;;  %v241_v63 = vpop.eup %240 }
  0x41   :  { %v228_v0 = vround.rtne.f32 %v185_v61  ;;  %v189_v3 = vmul.f32 %v241_v63, %v44_v58 }
  0x42   :  { %v229_v2 = vround.rtne.f32 %v187_v62 }
  0x43   :  { %v196_v4 = vmax.f32 %v228_v0, 0.0  ;;  %v243_v5 = vpop.eup %242  ;;  %v230_v7 = vround.rtne.f32 %v189_v3 }
  0x44   :  { %v197_v6 = vmax.f32 %v229_v2, 0.0  ;;  %v191_v9 = vmul.f32 %v243_v5, %v45_v1 }
  0x45   :  { %v200_v8 = vmin.f32 %v196_v4, 15.0  ;;  %v198_v11 = vmax.f32 %v230_v7, 0.0 }
  0x46   :  { %v201_v10 = vmin.f32 %v197_v6, 15.0  ;;  %v231_v13 = vround.rtne.f32 %v191_v9 }
  0x47   :  { %v204_v12 = vmul.f32 %v200_v8, %v128_v40  ;;  %v202_v15 = vmin.f32 %v198_v11, 15.0 }
  0x48   :  { %v205_v14 = vmul.f32 %v201_v10, %v145_v44  ;;  %v199_v16 = vmax.f32 %v231_v13, 0.0 }
  0x49   :  { %208 = vst [vmem:[#allocation7] sm:$0xff] %v204_v12  ;;  %v206_v17 = vmul.f32 %v202_v15, %v162_v48 }
  0x4a   :  { %209 = vst [vmem:[#allocation7 + $0x8] sm:$0xff] %v205_v14  ;;  %v203_v18 = vmin.f32 %v199_v16, 15.0 }
  0x4b   :  { %210 = vst [vmem:[#allocation7 + $0x10] sm:$0xff] %v206_v17 }
  0x4c   :  { %v207_v19 = vmul.f32 %v203_v18, %v179_v52 }
  0x4e   :  { %211 = vst [vmem:[#allocation7 + $0x18] sm:$0xff] %v207_v19 }
  0x4f   :  { %299 = shalt.err (!%p296_p6)
}
  0x50   :  { %s300_s8 = scalar_lea.hbm %s373_s2, 512 }
  0x51   :  { %p301_p7 = scmp.ne.s32.totalorder %s373_s2, %s300_s8  ;;  %p304_p8 = scmp.lt.u32.totalorder %s300_s8, %s373_s2 }
  0x53   :  { %p306_p9 = pnand %p304_p8, %p301_p7 }
  0x55   :  { %309 = shalt.err (!%p306_p9)
}
  0x56   :  { %221 = dma.vmem_to_hbm [thread:$0]  %s219_s4, 512, %s373_s2, [#allocation4]  }
  0x57   :  { %314 = dma.done.wait [#allocation4], 512  }
  0x58   :  { %315 = vsyncadd [#allocation4], 4294966784 }
  0x59   :  { %225 = vsyncpa [#allocation3], 1 }
  0x5a   :  { %226 = vsyncpa [#allocation6], 1 }
  0x5b   :  { %227 = vsyncpa [#allocation4], 1 }

</bundles_post_ra>
